<compile_context>
chip_gen: v5e
topology: v5e:2x2
jax: 0.10.0
libtpu: 0.0.40
codegen_flags: <defaults>
</compile_context>

<pallas_src>
import functools

import jax
import jax.numpy as jnp
from jax.experimental import pallas as pl
from jax.experimental.pallas import tpu as pltpu


def _round_up(x, m):
    return ((x + m - 1) // m) * m


# ----------------------------- Pallas kernel --------------------------------
def _edge_decoder_kernel(*refs, fused, num_rest, compute_dtype):
    """One tile_e-wide tile of edges, transposed (lane-dense) activations.

    refs, fused path:
      idx_ref   (2, TE)   int32 edge indices (row; col)          [streamed]
      tsrc_ref  (H, NSp)  transposed source-node table (cd)      [resident]
      ttgt_ref  (H, NTp)  transposed target-node table (cd)      [resident]
    refs, streamed path:
      zs_ref    (H, TE)   gathered source features (cd)          [streamed]
      zt_ref    (H, TE)   gathered target features (cd)          [streamed]
    then (both paths):
      w1_ref    (D, 2H)   first-layer weight, transposed (cd)    [resident]
      b1_ref    (D, 1)    first-layer bias (f32)                 [resident]
      [wr_ref   (R, D, D) remaining MLP weights, transposed (cd)]
      [br_ref   (R, D, 1) remaining MLP biases (f32)]
      wout_ref  (1, D)    output projection weight, transposed (cd)
      bout_ref  (1,)      output projection bias (f32, SMEM)
      o_ref     (1, TE)   sigmoid(logit), lane-dense f32
    """
    if fused:
        idx_ref, tsrc_ref, ttgt_ref, *rest = refs
    else:
        zs_ref, zt_ref, *rest = refs
    if num_rest > 0:
        w1_ref, b1_ref, wr_ref, br_ref, wout_ref, bout_ref, o_ref = rest
    else:
        w1_ref, b1_ref, wout_ref, bout_ref, o_ref = rest
        wr_ref = br_ref = None

    cd = compute_dtype
    te = o_ref.shape[1]

    if fused:
        # In-kernel gather from the VMEM-resident tables via one-hot matmul
        # (robust lowering, MXU slack is huge while memory-bound).
        idx = idx_ref[...]                      # (2, TE) int32
        row = idx[0:1, :]
        col = idx[1:2, :]
        ns = tsrc_ref.shape[1]
        nt = ttgt_ref.shape[1]
        iota_s = jax.lax.broadcasted_iota(jnp.int32, (ns, te), 0)
        iota_t = jax.lax.broadcasted_iota(jnp.int32, (nt, te), 0)
        oh_s = jnp.where(iota_s == row, 1.0, 0.0).astype(cd)   # (NSp, TE)
        oh_t = jnp.where(iota_t == col, 1.0, 0.0).astype(cd)   # (NTp, TE)
        zs = jnp.dot(tsrc_ref[...], oh_s,
                     preferred_element_type=jnp.float32).astype(cd)  # (H, TE)
        zt = jnp.dot(ttgt_ref[...], oh_t,
                     preferred_element_type=jnp.float32).astype(cd)  # (H, TE)
    else:
        zs = zs_ref[...]
        zt = zt_ref[...]

    # Single K=2H first-layer matmul: concat along sublanes (H % 8 == 0 here),
    # then W1^T (D, 2H) @ z (2H, TE) -> (D, TE) with fp32 accumulation.
    z = jnp.concatenate([zs, zt], axis=0)                       # (2H, TE)
    h = jnp.dot(w1_ref[...], z, preferred_element_type=jnp.float32)
    h = jnp.maximum(h + b1_ref[...], 0.0)       # ReLU; dropout==0 -> identity

    for l in range(num_rest):                   # static unroll over the rest
        h = jnp.dot(wr_ref[l], h.astype(cd),
                    preferred_element_type=jnp.float32)
        h = jnp.maximum(h + br_ref[l], 0.0)

    # Head: (1, D) @ (D, TE) -> (1, TE); lane-dense, no transpose, full-width
    # stores into the (1, E_pad) output.
    logit = jnp.dot(wout_ref[...], h.astype(cd),
                    preferred_element_type=jnp.float32)
    o_ref[...] = jax.nn.sigmoid(logit + bout_ref[0]).astype(o_ref.dtype)


# ------------------------------ Module wrapper -------------------------------
def edge_decoder_forward(z_dict, edge_label_index, params,
                         src_node_name, tgt_node_name, *,
                         tile_e=2048, compute_dtype=jnp.bfloat16,
                         fuse_gather=None, table_vmem_budget=4 << 20):
    """Mirrors EdgeDecoder.forward (eval mode, dropout inactive). Returns f32 [E].

    tile_e guidance: sweep 2048-4096 on v5e/v6e; 1024-2048 on v7x. Keep
    E_pad / tile_e >= 2 (ideally even) so both v7x TensorCores get work.
    """
    row, col = edge_label_index[0], edge_label_index[1]
    E = int(row.shape[0])
    cd = compute_dtype
    cd_bytes = jnp.dtype(cd).itemsize

    z_src_tbl = z_dict[src_node_name]
    z_tgt_tbl = z_dict[tgt_node_name]
    n_src, H = z_src_tbl.shape
    n_tgt, H2 = z_tgt_tbl.shape
    assert H == H2, "source/target hidden dims must match"
    D = 2 * H

    assert tile_e % 128 == 0, "tile_e must be a multiple of 128 (lane width)"
    G = max(int(pl.cdiv(E, tile_e)), 1)
    E_pad = G * tile_e
    if E_pad != E:                      # pad indices (cheap); padded rows sliced off
        pad = E_pad - E
        row = jnp.concatenate([row, jnp.zeros((pad,), row.dtype)])
        col = jnp.concatenate([col, jnp.zeros((pad,), col.dtype)])

    if fuse_gather is None:             # auto: fuse iff both tables fit the budget
        fuse_gather = (n_src + n_tgt) * H * cd_bytes <= table_vmem_budget

    w_mlp, b_mlp = params["w_mlp"], params["b_mlp"]        # (L, D, D), (L, D)
    w_out, b_out = params["w_out"], params["b_out"]        # (D, 1), (1,)
    L = int(w_mlp.shape[0])
    num_rest = L - 1

    # Transposed weights: activations are kept as (D, tile_e) (lane-dense).
    w1_t = w_mlp[0].T.astype(cd)                            # (D, 2H)
    b1 = b_mlp[0].reshape(D, 1).astype(jnp.float32)
    w_out_row = w_out.reshape(1, D).astype(cd)              # head weight, transposed
    b_out1 = b_out.reshape(1).astype(jnp.float32)

    args, in_specs = [], []
    ns_pad = nt_pad = 0
    if fuse_gather:
        ns_pad = _round_up(max(n_src, 8), 8)
        nt_pad = _round_up(max(n_tgt, 8), 8)
        tsrc_t = jnp.pad(z_src_tbl.T.astype(cd), ((0, 0), (0, ns_pad - n_src)))
        ttgt_t = jnp.pad(z_tgt_tbl.T.astype(cd), ((0, 0), (0, nt_pad - n_tgt)))
        edge_idx = jnp.stack([row, col], axis=0).astype(jnp.int32)   # (2, E_pad)
        args += [edge_idx, tsrc_t, ttgt_t]
        in_specs += [
            pl.BlockSpec((2, tile_e), lambda i: (0, i)),    # indices (8 B/edge stream)
            pl.BlockSpec((H, ns_pad), lambda i: (0, 0)),    # source table (resident)
            pl.BlockSpec((H, nt_pad), lambda i: (0, 0)),    # target table (resident)
        ]
    else:
        # Streamed fallback for large node tables: cast BEFORE the XLA gather so
        # the HBM intermediate is already narrow, and keep it lane-dense (H, E).
        zs_t = jnp.take(z_src_tbl.astype(cd).T, row, axis=1)   # (H, E_pad)
        zt_t = jnp.take(z_tgt_tbl.astype(cd).T, col, axis=1)   # (H, E_pad)
        args += [zs_t, zt_t]
        in_specs += [
            pl.BlockSpec((H, tile_e), lambda i: (0, i)),
            pl.BlockSpec((H, tile_e), lambda i: (0, i)),
        ]

    args += [w1_t, b1]
    in_specs += [
        pl.BlockSpec((D, D), lambda i: (0, 0)),             # W1^T (resident)
        pl.BlockSpec((D, 1), lambda i: (0, 0)),             # b1   (resident)
    ]
    if num_rest > 0:
        args += [jnp.transpose(w_mlp[1:], (0, 2, 1)).astype(cd),
                 b_mlp[1:].reshape(num_rest, D, 1).astype(jnp.float32)]
        in_specs += [pl.BlockSpec((num_rest, D, D), lambda i: (0, 0, 0)),
                     pl.BlockSpec((num_rest, D, 1), lambda i: (0, 0, 0))]
    args += [w_out_row, b_out1]
    in_specs += [
        pl.BlockSpec((1, D), lambda i: (0, 0)),                     # W_out^T
        pl.BlockSpec(memory_space=pltpu.MemorySpace.SMEM),          # scalar bias
    ]
    out_spec = pl.BlockSpec((1, tile_e), lambda i: (0, i))          # lane-dense out

    # Explicit VMEM budget with headroom (double-buffered inputs + temporaries),
    # capped at 32 MiB which is safe across v5e / v6e / v7x scoped limits.
    def nbytes(shape, dtype):
        n = 1
        for s in shape:
            n *= int(s)
        return n * jnp.dtype(dtype).itemsize

    if fuse_gather:
        stream_in = nbytes((2, tile_e), jnp.int32)
        resident_in = nbytes((H, ns_pad), cd) + nbytes((H, nt_pad), cd)
        temps = (2 * (ns_pad + nt_pad) * tile_e * 4          # iota / one-hot temps
                 + 2 * H * tile_e * cd_bytes)                # gathered zs / zt
    else:
        stream_in = 2 * nbytes((H, tile_e), cd)
        resident_in = 0
        temps = 0
    resident_in += (nbytes((D, D), cd) + nbytes((D, 1), jnp.float32)
                    + nbytes((1, D), cd))
    if num_rest > 0:
        resident_in += (nbytes((num_rest, D, D), cd)
                        + nbytes((num_rest, D, 1), jnp.float32))
    temps += 3 * D * tile_e * 4                              # h (f32) + cast copies
    out_tile = nbytes((1, tile_e), jnp.float32)
    vmem_need = 2 * (stream_in + resident_in + out_tile) + temps
    vmem_limit = int(min(max(2 * vmem_need, 4 << 20), 32 << 20))

    flops = 2 * E_pad * D * D * L + 2 * E_pad * D
    if fuse_gather:
        flops += 2 * E_pad * H * (ns_pad + nt_pad)
    cost = pl.CostEstimate(
        flops=flops,
        transcendentals=E_pad,
        bytes_accessed=sum(int(a.size) * a.dtype.itemsize for a in args)
        + E_pad * 4,
    )

    out = pl.pallas_call(
        functools.partial(_edge_decoder_kernel, fused=fuse_gather,
                          num_rest=num_rest, compute_dtype=cd),
        out_shape=jax.ShapeDtypeStruct((1, E_pad), jnp.float32),
        grid_spec=pltpu.PrefetchScalarGridSpec(
            num_scalar_prefetch=0,
            grid=(G,),
            in_specs=in_specs,
            out_specs=out_spec,
        ),
        compiler_params=pltpu.CompilerParams(
            dimension_semantics=("parallel",),   # grid >= 2 keeps both v7x TCs busy
            vmem_limit_bytes=vmem_limit,
        ),
        cost_estimate=cost,
    )(*args)
    return out.reshape(-1)[:E]


# ------------------------------ Param init / ref ------------------------------
def init_params(key, hidden_channels, num_layers=1):
    """Deterministic param init matching torch.nn.Linear fan-in uniform."""
    D = 2 * hidden_channels
    keys = jax.random.split(key, 2 * num_layers + 2)
    bound = 1.0 / jnp.sqrt(D)
    w_mlp = jnp.stack([
        jax.random.uniform(keys[2 * l], (D, D), jnp.float32, -bound, bound)
        for l in range(num_layers)])
    b_mlp = jnp.stack([
        jax.random.uniform(keys[2 * l + 1], (D,), jnp.float32, -bound, bound)
        for l in range(num_layers)])
    w_out = jax.random.uniform(keys[-2], (D, 1), jnp.float32, -bound, bound)
    b_out = jax.random.uniform(keys[-1], (1,), jnp.float32, -bound, bound)
    return {"w_mlp": w_mlp, "b_mlp": b_mlp, "w_out": w_out, "b_out": b_out}


def edge_decoder_reference(z_dict, edge_label_index, params,
                           src_node_name, tgt_node_name):
    row, col = edge_label_index[0], edge_label_index[1]
    z = jnp.concatenate([z_dict[src_node_name][row],
                         z_dict[tgt_node_name][col]], axis=-1)
    L = params["w_mlp"].shape[0]
    h = z
    for l in range(L):
        h = jnp.maximum(h @ params["w_mlp"][l] + params["b_mlp"][l], 0.0)
    logit = h @ params["w_out"] + params["b_out"]
    return jax.nn.sigmoid(logit).reshape(-1)


# ---------------------------------- main -------------------------------------
if __name__ == "__main__":
    hidden_channels = 32          # -> H = 32, D = 2H = 64
    n_src, n_tgt = 24, 40
    E = 1000                      # not a multiple of tile_e: exercises padding
    tile_e = 256                  # -> E_pad = 1024, grid = 4 (even, >= 2)

    key = jax.random.PRNGKey(0)
    k_src, k_tgt, k_row, k_col, k_p1, k_p2 = jax.random.split(key, 6)

    z_dict = {
        "material": jax.random.normal(k_src, (n_src, hidden_channels), jnp.float32),
        "element": jax.random.normal(k_tgt, (n_tgt, hidden_channels), jnp.float32),
    }
    edge_label_index = jnp.stack([
        jax.random.randint(k_row, (E,), 0, n_src, jnp.int32),
        jax.random.randint(k_col, (E,), 0, n_tgt, jnp.int32),
    ], axis=0)

    checks = [
        # (num_layers, compute_dtype, fuse_gather, tol)
        (1, jnp.float32, True, 1e-5),    # default module config, fused gather
        (2, jnp.float32, True, 1e-5),    # multi-layer MLP, fused gather
        (2, jnp.float32, False, 1e-5),   # streamed fallback (large-table path)
        (2, jnp.bfloat16, True, 2e-2),   # default bf16 stream dtype, f32 accum
    ]
    for num_layers, cd, fuse, tol in checks:
        params = init_params(k_p1 if num_layers == 1 else k_p2,
                             hidden_channels, num_layers)
        out = edge_decoder_forward(z_dict, edge_label_index, params,
                                   src_node_name="material",
                                   tgt_node_name="element",
                                   tile_e=tile_e, compute_dtype=cd,
                                   fuse_gather=fuse)
        out = jax.block_until_ready(out)
        ref = edge_decoder_reference(z_dict, edge_label_index, params,
                                     src_node_name="material",
                                     tgt_node_name="element")
        assert out.shape == (E,)
        assert jnp.allclose(out, ref, atol=tol, rtol=tol), (
            f"mismatch vs reference (L={num_layers}, dtype={cd}, "
            f"fused={fuse}, tol={tol})")

    print("KERNEL_OK")
</pallas_src>

<mosaic_0001>
module attributes {stable_mosaic.version = 11 : i64} {
  func.func @_edge_decoder_kernel(%arg0: i32, %arg1: memref<2x256xi32, #tpu.memory_space<vmem>>, %arg2: memref<32x24xf32, #tpu.memory_space<vmem>>, %arg3: memref<32x40xf32, #tpu.memory_space<vmem>>, %arg4: memref<64x64xf32, #tpu.memory_space<vmem>>, %arg5: memref<64x1xf32, #tpu.memory_space<vmem>>, %arg6: memref<1x64xf32, #tpu.memory_space<vmem>>, %arg7: memref<1xf32, #tpu.memory_space<smem>>, %arg8: memref<1x256xf32, #tpu.memory_space<vmem>>) attributes {dimension_semantics = [#tpu.dimension_semantics<parallel>], iteration_bounds = array<i64: 4>, scalar_prefetch = 0 : i64, scratch_operands = 0 : i64, tpu.core_type = #tpu.core_type<tc>, window_params = [{transform_indices = @transform_0, window_bounds = array<i64: 2, 256>}, {pipeline_mode = #tpu.pipeline_mode<synchronous>, transform_indices = @transform_1, window_bounds = array<i64: 32, 24>}, {pipeline_mode = #tpu.pipeline_mode<synchronous>, transform_indices = @transform_2, window_bounds = array<i64: 32, 40>}, {pipeline_mode = #tpu.pipeline_mode<synchronous>, transform_indices = @transform_3, window_bounds = array<i64: 64, 64>}, {pipeline_mode = #tpu.pipeline_mode<synchronous>, transform_indices = @transform_4, window_bounds = array<i64: 64, 1>}, {pipeline_mode = #tpu.pipeline_mode<synchronous>, transform_indices = @transform_5, window_bounds = array<i64: 1, 64>}, {transform_indices = @transform_6, window_bounds = array<i64: 1>}, {transform_indices = @transform_7, window_bounds = array<i64: 1, 256>}]} {
    %c0 = arith.constant 0 : index
    %c0_0 = arith.constant 0 : index
    %0 = vector.load %arg1[%c0, %c0_0] : memref<2x256xi32, #tpu.memory_space<vmem>>, vector<2x256xi32>
    %1 = vector.extract_strided_slice %0 {offsets = [0, 0], sizes = [1, 256], strides = [1, 1]} : vector<2x256xi32> to vector<1x256xi32>
    %2 = vector.extract_strided_slice %0 {offsets = [1, 0], sizes = [1, 256], strides = [1, 1]} : vector<2x256xi32> to vector<1x256xi32>
    %3 = tpu.iota {dimensions = array<i32: 0>} : vector<24x256xi32>
    %4 = tpu.iota {dimensions = array<i32: 0>} : vector<40x256xi32>
    %5 = vector.broadcast %1 : vector<1x256xi32> to vector<24x256xi32>
    %6 = arith.cmpi eq, %3, %5 : vector<24x256xi32>
    %cst = arith.constant 1.000000e+00 : f32
    %cst_1 = arith.constant 0.000000e+00 : f32
    %7 = vector.broadcast %cst : f32 to vector<24x256xf32>
    %8 = vector.broadcast %cst_1 : f32 to vector<24x256xf32>
    %9 = arith.select %6, %7, %8 : vector<24x256xi1>, vector<24x256xf32>
    %10 = vector.broadcast %2 : vector<1x256xi32> to vector<40x256xi32>
    %11 = arith.cmpi eq, %4, %10 : vector<40x256xi32>
    %cst_2 = arith.constant 1.000000e+00 : f32
    %cst_3 = arith.constant 0.000000e+00 : f32
    %12 = vector.broadcast %cst_2 : f32 to vector<40x256xf32>
    %13 = vector.broadcast %cst_3 : f32 to vector<40x256xf32>
    %14 = arith.select %11, %12, %13 : vector<40x256xi1>, vector<40x256xf32>
    %c0_4 = arith.constant 0 : index
    %c0_5 = arith.constant 0 : index
    %15 = vector.load %arg2[%c0_4, %c0_5] : memref<32x24xf32, #tpu.memory_space<vmem>>, vector<32x24xf32>
    %cst_6 = arith.constant dense<0.000000e+00> : vector<32x256xf32>
    %16 = tpu.matmul %15, %9, %cst_6 {dimension_numbers = #tpu.dot_dimension_numbers<[1], [0], [0], [1], [0, 0, 1, 1], [], []>} : vector<32x24xf32>, vector<24x256xf32>, vector<32x256xf32> -> vector<32x256xf32>
    %c0_7 = arith.constant 0 : index
    %c0_8 = arith.constant 0 : index
    %17 = vector.load %arg3[%c0_7, %c0_8] : memref<32x40xf32, #tpu.memory_space<vmem>>, vector<32x40xf32>
    %cst_9 = arith.constant dense<0.000000e+00> : vector<32x256xf32>
    %18 = tpu.matmul %17, %14, %cst_9 {dimension_numbers = #tpu.dot_dimension_numbers<[1], [0], [0], [1], [0, 0, 1, 1], [], []>} : vector<32x40xf32>, vector<40x256xf32>, vector<32x256xf32> -> vector<32x256xf32>
    %19 = tpu.concatenate %16, %18 in 0 : vector<32x256xf32>, vector<32x256xf32> -> vector<64x256xf32>
    %c0_10 = arith.constant 0 : index
    %c0_11 = arith.constant 0 : index
    %20 = vector.load %arg4[%c0_10, %c0_11] : memref<64x64xf32, #tpu.memory_space<vmem>>, vector<64x64xf32>
    %cst_12 = arith.constant dense<0.000000e+00> : vector<64x256xf32>
    %21 = tpu.matmul %20, %19, %cst_12 {dimension_numbers = #tpu.dot_dimension_numbers<[1], [0], [0], [1], [0, 0, 1, 1], [], []>} : vector<64x64xf32>, vector<64x256xf32>, vector<64x256xf32> -> vector<64x256xf32>
    %c0_13 = arith.constant 0 : index
    %c0_14 = arith.constant 0 : index
    %22 = vector.load %arg5[%c0_13, %c0_14] : memref<64x1xf32, #tpu.memory_space<vmem>>, vector<64x1xf32>
    %23 = vector.broadcast %22 : vector<64x1xf32> to vector<64x256xf32>
    %24 = arith.addf %21, %23 : vector<64x256xf32>
    %cst_15 = arith.constant 0.000000e+00 : f32
    %25 = vector.broadcast %cst_15 : f32 to vector<64x256xf32>
    %26 = arith.maximumf %24, %25 : vector<64x256xf32>
    %c0_16 = arith.constant 0 : index
    %c0_17 = arith.constant 0 : index
    %27 = vector.load %arg6[%c0_16, %c0_17] : memref<1x64xf32, #tpu.memory_space<vmem>>, vector<1x64xf32>
    %cst_18 = arith.constant dense<0.000000e+00> : vector<1x256xf32>
    %28 = tpu.matmul %27, %26, %cst_18 {dimension_numbers = #tpu.dot_dimension_numbers<[1], [0], [0], [1], [0, 0, 1, 1], [], []>} : vector<1x64xf32>, vector<64x256xf32>, vector<1x256xf32> -> vector<1x256xf32>
    %c0_19 = arith.constant 0 : index
    %29 = memref.load %arg7[%c0_19] : memref<1xf32, #tpu.memory_space<smem>>
    %30 = vector.broadcast %29 : f32 to vector<1x256xf32>
    %31 = arith.addf %28, %30 : vector<1x256xf32>
    %32 = arith.negf %31 : vector<1x256xf32>
    %33 = math.exp %32 : vector<1x256xf32>
    %cst_20 = arith.constant 1.000000e+00 : f32
    %34 = vector.broadcast %cst_20 : f32 to vector<1x256xf32>
    %35 = arith.addf %34, %33 : vector<1x256xf32>
    %36 = arith.divf %34, %35 : vector<1x256xf32>
    %c0_21 = arith.constant 0 : index
    %c0_22 = arith.constant 0 : index
    %37 = vector.load %arg8[%c0_21, %c0_22] : memref<1x256xf32, #tpu.memory_space<vmem>>, vector<1x256xf32>
    tpu.vector_store %arg8[%c0_21, %c0_22], %36 {strides = array<i32>} : memref<1x256xf32, #tpu.memory_space<vmem>>, vector<1x256xf32>,
    return
  }
  func.func @transform_0(%arg0: i32) -> (i32, i32) {
    %c0_i32 = arith.constant 0 : i32
    %c0_i32_0 = arith.constant 0 : i32
    return %c0_i32, %arg0 : i32, i32
  }
  func.func @transform_1(%arg0: i32) -> (i32, i32) {
    %c0_i32 = arith.constant 0 : i32
    %c0_i32_0 = arith.constant 0 : i32
    %c0_i32_1 = arith.constant 0 : i32
    return %c0_i32, %c0_i32_0 : i32, i32
  }
  func.func @transform_2(%arg0: i32) -> (i32, i32) {
    %c0_i32 = arith.constant 0 : i32
    %c0_i32_0 = arith.constant 0 : i32
    %c0_i32_1 = arith.constant 0 : i32
    return %c0_i32, %c0_i32_0 : i32, i32
  }
  func.func @transform_3(%arg0: i32) -> (i32, i32) {
    %c0_i32 = arith.constant 0 : i32
    %c0_i32_0 = arith.constant 0 : i32
    %c0_i32_1 = arith.constant 0 : i32
    return %c0_i32, %c0_i32_0 : i32, i32
  }
  func.func @transform_4(%arg0: i32) -> (i32, i32) {
    %c0_i32 = arith.constant 0 : i32
    %c0_i32_0 = arith.constant 0 : i32
    %c0_i32_1 = arith.constant 0 : i32
    return %c0_i32, %c0_i32_0 : i32, i32
  }
  func.func @transform_5(%arg0: i32) -> (i32, i32) {
    %c0_i32 = arith.constant 0 : i32
    %c0_i32_0 = arith.constant 0 : i32
    %c0_i32_1 = arith.constant 0 : i32
    return %c0_i32, %c0_i32_0 : i32, i32
  }
  func.func @transform_6(%arg0: i32) -> i32 {
    %c0_i32 = arith.constant 0 : i32
    %c0_i32_0 = arith.constant 0 : i32
    return %c0_i32 : i32
  }
  func.func @transform_7(%arg0: i32) -> (i32, i32) {
    %c0_i32 = arith.constant 0 : i32
    %c0_i32_0 = arith.constant 0 : i32
    return %c0_i32, %arg0 : i32, i32
  }
}

</mosaic_0001>

<bundles_post_ra>
// kernel: tpu_custom_call.1
= control target key start
LH: loop header
LB: loop body
LE: loop exit
PB: predicated region body
PF: predicated region fallthrough
CT: control target
= control target key end

     0   :  { %s1275_s0 = inlined_call_operand.vmem [shape: s32[2,1024], index: 0, kind: input, shape index: {}]   ;;  %s1276_s1 = inlined_call_operand.vmem [shape: f32[32,24], index: 1, kind: input, shape index: {}]   ;;  %s1277_s2 = inlined_call_operand.vmem [shape: f32[32,40], index: 2, kind: input, shape index: {}]   ;;  %s1278_s3 = inlined_call_operand.vmem [shape: f32[64,64], index: 3, kind: input, shape index: {}]   ;;  %s1279_s4 = inlined_call_operand.vmem [shape: f32[64,1], index: 4, kind: input, shape index: {}]   ;;  %s1280_s5 = inlined_call_operand.vmem [shape: f32[1,64], index: 5, kind: input, shape index: {}]   ;;  %s1281_s6 = inlined_call_operand.<no memory space> [shape: f32[1], index: 6, kind: input, shape index: {}]   ;;  %s1282_s7 = inlined_call_operand.hbm [shape: f32[1,1024], index: 7, kind: output, shape index: {}]  }
   0x1   :  { %12 = sst [smem:[#allocation2]] %s1281_s6 }
   0x2   :  { %13 = vsyncpa [#allocation4], 0 }
   0x3   :  { %15 = vsyncpa [#allocation4 + $0x1], 0  ;;  %s1067_s26 = smov 0   ;;  %s1069_s27 = smov 0  }
   0x4   :  { %s1071_s28 = smov 0   ;;  %s1073_s29 = smov 0  }
   0x5 LB: > { %s826_s6 = sadd.s32 4294967295, %s1020_s29   ;;  %s827_s30 = sadd.s32 4294967294, %s1020_s29   ;;  %s1020_s29 = sphi %s1073_s29, %s1290_s29   ;;  %s1016_s28 = sphi %s1071_s28, %s1289_s28   ;;  %s1012_s27 = sphi %s1069_s27, %s1288_s27   ;;  %s1008_s26 = sphi %s1067_s26, %s1287_s26  }
   0x6   : > { %s1090_s8 = sadd.s32 1, %s1020_s29   ;;  %s180_s9 = sadd.s32 1, %s1016_s28 }
   0x7   : > { %s177_s10 = ssub.s32 %s1020_s29, %s1090_s8  ;;  %p190_p0 = scmp.ne.s32.totalorder %s1016_s28, %s1012_s27 }
   0x8   : > { %p178_p1 = scmp.eq.s32.totalorder %s177_s10, 0  ;;  %p191_p2 = scmp.eq.s32.totalorder %s826_s6, 3 }
   0x9   : > { %p196_p3 = scmp.ne.s32.totalorder %s1012_s27, %s1008_s26  ;;  %p197_p4 = scmp.eq.s32.totalorder %s827_s30, 3 }
   0xa   : > { %s1100_s11 = scalar_select %p178_p1, %s1016_s28, %s180_s9  }
   0xb   : > { %p1102_p5 = por %p191_p2, %p190_p0  ;;  %p1106_p6 = por %p197_p4, %p196_p3 }
   0xc   : > { %p830_p7 = scmp.ge.s32.totalorder %s1020_s29, 1  ;;  %p242_p8 = scmp.lt.s32.totalorder %s1020_s29, 5 }
   0xe   : > { %p243_p9 = pnand %p830_p7, %p242_p8 }
   0xf   : > { %s1112_s14 = sshll.u32 (!%p243_p9), %s826_s6, 1  ;;  %s658_s25 = sld [smem:[#allocation2]] (!%p243_p9) }
  0x10   : > { %246 = sbr.rel (%p243_p9) target bundleno = 552 (0x228), region = 48  ;;  %p275_p10 = scmp.lt.s32.totalorder (!%p243_p9), %s1112_s14, 7 }
  0x11   : > { %s271_s6 = sand.u32 (!%p243_p9), 1, %s1012_s27   ;;  %s978_s23 = scalar_lea.hbm (!%p243_p9), %s1282_s7, 8 }
  0x12   : > { %s1232_s30 = sshll.u32 (!%p243_p9), %s271_s6, 1 }
  0x15   : > { %v282_v0 = vlaneseq  ;;  %s276_s15 = scalar_select %p275_p10, %s1112_s14, 7  ;;  %v1022_v15 = vmov 1.0   ;;  %v403_v16 = vld [vmem:[%s1277_s2] sm:$0xff]  ;;  %v404_v18 = vld [vmem:[%s1277_s2 + $0x8] sm:$0xff]  ;;  %v405_v20 = vld [vmem:[%s1277_s2 + $0x10] sm:$0xff]  ;;  %v1023_v28 = vmov 0  }
  0x16   : > { %v328_v17 = vld [vmem:[%s1276_s1] sm:$0xff]  ;;  %v329_v19 = vld [vmem:[%s1276_s1 + $0x8] sm:$0xff]  ;;  %v330_v21 = vld [vmem:[%s1276_s1 + $0x10] sm:$0xff]  ;;  %948 = vset.pattern.permute.xlu1 %v1023_v28  ;;  %947 = vset.pattern.permute.xlu0 %v1023_v28 }
  0x17   : > { %v283_v1 = vshrl.u32 %v282_v0, 7  ;;  %s833_s16 = sshll.u32 %s276_s15, 1  ;;  %v406_v22 = vld [vmem:[%s1277_s2 + $0x18] sm:$0xff]  ;;  %v491_v29 = vld [vmem:[%s1279_s4 + $0x28] sm:$0xff]  ;;  %949 = vset.pattern.permute.xlu2 %v1023_v28  ;;  %v490_v35 = vld [vmem:[%s1279_s4 + $0x20] sm:$0xff]  ;;  %s763_s15 = scalar_lea.hbm %s1282_s7, %s1112_s14 }
  0x18   : > { %s278_s19 = scalar_lea.vmem %s1275_s0, %s833_s16  ;;  %v331_v23 = vld [vmem:[%s1276_s1 + $0x18] sm:$0xff]  ;;  %521 = vperm.xlu1 %948, %v491_v29   ;;  %v492_v39 = vld [vmem:[%s1279_s4 + $0x30] sm:$0xff]  ;;  %v486_v40 = vld [vmem:[%s1279_s4] sm:$0xff]  ;;  %s273_s16 = scalar_lea.vmem [#allocation3], %s1232_s30 }
  0x19   : > { %v281_v2 = vld [vmem:[%s278_s19] sm:$0xf]  ;;  %v287_v3 = vadd.s32 32, %v283_v1  ;;  %v286_v4 = vadd.s32 24, %v283_v1  ;;  %v285_v11 = vadd.s32 16, %v283_v1  ;;  %v284_v13 = vadd.s32 8, %v283_v1 }
  0x1a   : > { %v304_v5 = vperm.slane %v281_v2, 1  ;;  %v305_v6 = vperm.slane %v281_v2, 3  ;;  %v288_v7 = vperm.slane %v281_v2, 0  ;;  %v289_v8 = vperm.slane %v281_v2, 2  ;;  %v493_v34 = vld [vmem:[%s1279_s4 + $0x38] sm:$0xff]  ;;  %v478_v46 = vld [vmem:[%s1278_s3] sm:$0xff] }
  0x1b   : > { %531 = vperm.xlu0 %947, %v493_v34   ;;  %v483_v47 = vld [vmem:[%s1278_s3 + $0x28] sm:$0xff]  ;;  %v489_v49 = vld [vmem:[%s1279_s4 + $0x18] sm:$0xff]  ;;  %v484_v51 = vld [vmem:[%s1278_s3 + $0x30] sm:$0xff]  ;;  %s765_s17 = sshll.u32 %s273_s16, 4  ;;  %s767_s18 = sshll.u32 %s763_s15, 4  ;;  %s766_s17 = int_to_ptr.vmem [resolvable:$true] %s765_s17  ;;  %s768_s18 = int_to_ptr.hbm [resolvable:$true] %s767_s18 }
  0x1c   : > { %v306_v9 = vperm.slane %v304_v5, 1  ;;  %v307_v10 = vperm.slane %v305_v6, 1  ;;  %v290_v12 = vperm.slane %v288_v7, 0  ;;  %v291_v14 = vperm.slane %v289_v8, 0  ;;  %v487_v48 = vld [vmem:[%s1279_s4 + $0x8] sm:$0xff]  ;;  %511 = vperm.xlu2 %949, %v489_v49   ;;  %v488_v52 = vld [vmem:[%s1279_s4 + $0x10] sm:$0xff] }
  0x1d   : > { %v479_v50 = vld [vmem:[%s1278_s3 + $0x8] sm:$0xff]  ;;  %v480_v53 = vld [vmem:[%s1278_s3 + $0x10] sm:$0xff]  ;;  %v485_v54 = vld [vmem:[%s1278_s3 + $0x38] sm:$0xff]  ;;  %s753_s14 = scalar_lea.sflag [#allocation4], %s271_s6  ;;  %s972_s19 = sshra.s32 %s768_s18, 4  ;;  %s973_s19 = int_to_ptr.hbm [resolvable:$true] %s972_s19 }
  0x1e   : > { %vm316_vm0 = vcmp.eq.s32.totalorder %v287_v3, %v306_v9  ;;  %vm317_vm1 = vcmp.eq.s32.totalorder %v287_v3, %v307_v10  ;;  %vm314_vm2 = vcmp.eq.s32.totalorder %v286_v4, %v306_v9  ;;  %vm315_vm3 = vcmp.eq.s32.totalorder %v286_v4, %v307_v10  ;;  %v481_v55 = vld [vmem:[%s1278_s3 + $0x18] sm:$0xff]  ;;  %v482_v56 = vld [vmem:[%s1278_s3 + $0x20] sm:$0xff]  ;;  %s974_s20 = scalar_lea.hbm %s973_s19, 2  ;;  %p979_p0 = scmp.lt.s32.totalorder %s973_s19, %s1282_s7 }
  0x1f   : > { %848 = vmatpush.msk.msra.mxu2 %vm316_vm0, %v1022_v15  ;;  %857 = vmatpush.msk.msra.mxu3 %vm317_vm1, %v1022_v15  ;;  %vm312_vm4 = vcmp.eq.s32.totalorder %v285_v11, %v306_v9  ;;  %vm313_vm5 = vcmp.eq.s32.totalorder %v285_v11, %v307_v10  ;;  %vm296_vm6 = vcmp.eq.s32.totalorder %v285_v11, %v290_v12  ;;  %vm407_vm0 = vcmask 326656   ;;  %v657_v49 = vld [vmem:[%s1280_s5] sm:$0x1]  ;;  %p975_p11 = scmp.ne.s32.totalorder %s973_s19, %s974_s20  ;;  %p980_p1 = scmp.lt.s32.totalorder %s978_s23, %s974_s20 }
  0x20   : > { %vm297_vm7 = vcmp.eq.s32.totalorder %v285_v11, %v291_v14  ;;  %vm294_vm8 = vcmp.eq.s32.totalorder %v284_v13, %v290_v12  ;;  %vm295_vm9 = vcmp.eq.s32.totalorder %v284_v13, %v291_v14  ;;  %vm310_vm10 = vcmp.eq.s32.totalorder %v284_v13, %v306_v9  ;;  %834 = vmatpush.msk.msra.mxu0 %vm296_vm6, %v1022_v15 }
  0x21   : > { %849 = vmatpush.msk.msra.mxu2 %vm314_vm2, %v1022_v15  ;;  %858 = vmatpush.msk.msra.mxu3 %vm315_vm3, %v1022_v15  ;;  %vm311_vm11 = vcmp.eq.s32.totalorder %v284_v13, %v307_v10  ;;  %vm292_vm12 = vcmp.eq.s32.totalorder %v283_v1, %v290_v12  ;;  %vm293_vm13 = vcmp.eq.s32.totalorder %v283_v1, %v291_v14  ;;  %vm332_vm1 = vcmask 195584   ;;  %p976_p12 = pnand %p975_p11, %p1102_p5  ;;  %p981_p2 = por %p980_p1, %p979_p0 }
  0x22   : > { %841 = vmatpush.msk.msra.mxu1 %vm297_vm7, %v1022_v15  ;;  %vm308_vm14 = vcmp.eq.s32.totalorder %v283_v1, %v306_v9  ;;  %vm309_vm15 = vcmp.eq.s32.totalorder %v283_v1, %v307_v10  ;;  %835 = vmatpush.msk.msra.mxu0 %vm294_vm8, %v1022_v15  ;;  %vm534_vm2 = vcmask 523264  }
  0x23   : > { %850 = vmatpush.msk.msra.mxu2 %vm312_vm4, %v1022_v15  ;;  %859 = vmatpush.msk.msra.mxu3 %vm313_vm5, %v1022_v15  ;;  %p977_p13 = pneg %p976_p12 }
  0x24   : > { %842 = vmatpush.msk.msra.mxu1 %vm295_vm9, %v1022_v15  ;;  %836 = vmatpush.msk.msra.mxu0 %vm292_vm12, %v1022_v15  ;;  %vm749_vm12 = vcmp.lt.s32.totalorder %v282_v0, 256 }
  0x25   : > { %851 = vmatpush.msk.msra.mxu2 %vm310_vm10, %v1022_v15  ;;  %860 = vmatpush.msk.msra.mxu3 %vm311_vm11, %v1022_v15  ;;  %vm744_vm10 = vcmask 1040384   ;;  %p982_p3 = pnand %p981_p2, %p977_p13 }
  0x26   : > { %843 = vmatpush.msk.msra.mxu1 %vm293_vm13, %v1022_v15  ;;  %837 = vmatmul.msk.f32.vlgmr.msra.gmra.mxu0 %vm332_vm1, %v328_v17 }
  0x27   : > { %852 = vmatpush.msk.msra.mxu2 %vm308_vm14, %v1022_v15  ;;  %861 = vmatpush.msk.msra.mxu3 %vm309_vm15, %v1022_v15 }
  0x28   : > { %853 = vmatmul.msk.f32.vlgmr.msra.gmra.mxu2 %vm407_vm0, %v403_v16  ;;  %862 = vmatmul.msk.f32.vlgmr.msra.gmra.mxu3 %vm407_vm0, %v403_v16 }
  0x29   : > { %844 = vmatmul.msk.f32.vlgmr.msra.gmra.mxu1 %vm332_vm1, %v328_v17  ;;  %516 = vperm.xlu1 %948, %v490_v35  }
  0x2a   : > { %526 = vperm.xlu0 %947, %v492_v39   ;;  %506 = vperm.xlu2 %949, %v488_v52  }
  0x2e   : > { %838 = vmatmul.msk.f32.gmra.mxu0 %vm332_vm1, %v329_v19 }
  0x30   : > { %854 = vmatmul.msk.f32.gmra.mxu2 %vm407_vm0, %v404_v18  ;;  %863 = vmatmul.msk.f32.gmra.mxu3 %vm407_vm0, %v404_v18 }
  0x31   : > { %845 = vmatmul.msk.f32.gmra.mxu1 %vm332_vm1, %v329_v19  ;;  %496 = vperm.xlu1 %948, %v486_v40  }
  0x32   : > { %501 = vperm.xlu0 %947, %v487_v48  }
  0x36   : > { %839 = vmatmul.msk.f32.gmra.mxu0 %vm332_vm1, %v330_v21 }
  0x38   : > { %855 = vmatmul.msk.f32.gmra.mxu2 %vm407_vm0, %v405_v20  ;;  %864 = vmatmul.msk.f32.gmra.mxu3 %vm407_vm0, %v405_v20 }
  0x39   : > { %846 = vmatmul.msk.f32.gmra.mxu1 %vm332_vm1, %v330_v21 }
  0x3e   : > { %840 = vmatmul.msk.f32.gmra.mxu0 %vm332_vm1, %v331_v23 }
  0x40   : > { %856 = vmatmul.msk.f32.gmra.mxu2 %vm407_vm0, %v406_v22  ;;  %865 = vmatmul.msk.f32.gmra.mxu3 %vm407_vm0, %v406_v22 }
  0x41   : > { %847 = vmatmul.msk.f32.gmra.mxu1 %vm332_vm1, %v331_v23 }
  0x76   : > { %v512_v9 = vpop.permute.xlu2 %511 }
  0x8a   : > { %v522_v4 = vpop.permute.xlu1 %521 }
  0x8d   : > { %v532_v63 = vpop.permute.xlu0 %531 }
  0x9b   : > { %v517_v20 = vpop.permute.xlu1 %516 }
  0x9c   : > { %v527_v6 = vpop.permute.xlu0 %526 }
  0xa3   : > { %v362_v24 = vpop.f32.mrf.mxu0 }
  0xa6   : > { %v391_v27 = vpop.f32.mrf.mxu1 }
  0xab   : > { %v437_v25 = vpop.f32.mrf.mxu2  ;;  %v466_v26 = vpop.f32.mrf.mxu3 }
  0xac   : > { %v365_v32 = vpop.f32.mrf.mxu0 }
  0xae   : > { %v394_v33 = vpop.f32.mrf.mxu1 }
  0xb3   : > { %v440_v30 = vpop.f32.mrf.mxu2  ;;  %v469_v31 = vpop.f32.mrf.mxu3 }
  0xb4   : > { %v368_v38 = vpop.f32.mrf.mxu0 }
  0xb6   : > { %v397_v41 = vpop.f32.mrf.mxu1 }
  0xbb   : > { %v443_v36 = vpop.f32.mrf.mxu2  ;;  %v472_v37 = vpop.f32.mrf.mxu3 }
  0xbc   : > { %v371_v44 = vpop.f32.mrf.mxu0 }
  0xbe   : > { %v400_v45 = vpop.f32.mrf.mxu1 }
  0xc3   : > { %v446_v42 = vpop.f32.mrf.mxu2  ;;  %v475_v43 = vpop.f32.mrf.mxu3 }
  0xc4   : > { %567 = vmatpush.msrb.mxu0 %v446_v42  ;;  %890 = vmatpush.msrb.mxu2 %v446_v42 }
  0xc5   : > { %608 = vmatpush.msrb.mxu1 %v475_v43  ;;  %898 = vmatpush.msrb.mxu3 %v475_v43 }
  0xc6   : > { %568 = vmatpush.msrb.mxu0 %v443_v36  ;;  %891 = vmatpush.msrb.mxu2 %v443_v36 }
  0xc7   : > { %609 = vmatpush.msrb.mxu1 %v472_v37  ;;  %899 = vmatpush.msrb.mxu3 %v472_v37  ;;  %v497_v37 = vpop.permute.xlu1 %496 }
  0xc8   : > { %569 = vmatpush.msrb.mxu0 %v440_v30  ;;  %892 = vmatpush.msrb.mxu2 %v440_v30 }
  0xc9   : > { %610 = vmatpush.msrb.mxu1 %v469_v31  ;;  %900 = vmatpush.msrb.mxu3 %v469_v31 }
  0xca   : > { %570 = vmatpush.msrb.mxu0 %v437_v25  ;;  %893 = vmatpush.msrb.mxu2 %v437_v25 }
  0xcb   : > { %611 = vmatpush.msrb.mxu1 %v466_v26  ;;  %901 = vmatpush.msrb.mxu3 %v466_v26 }
  0xcc   : > { %571 = vmatpush.msrb.mxu0 %v371_v44  ;;  %894 = vmatpush.msrb.mxu2 %v371_v44 }
  0xcd   : > { %612 = vmatpush.msrb.mxu1 %v400_v45  ;;  %902 = vmatpush.msrb.mxu3 %v400_v45 }
  0xce   : > { %572 = vmatpush.msrb.mxu0 %v368_v38  ;;  %895 = vmatpush.msrb.mxu2 %v368_v38 }
  0xcf   : > { %613 = vmatpush.msrb.mxu1 %v397_v41  ;;  %903 = vmatpush.msrb.mxu3 %v397_v41 }
  0xd0   : > { %573 = vmatpush.msrb.mxu0 %v365_v32  ;;  %896 = vmatpush.msrb.mxu2 %v365_v32  ;;  %v502_v32 = vpop.permute.xlu0 %501 }
  0xd1   : > { %614 = vmatpush.msrb.mxu1 %v394_v33  ;;  %904 = vmatpush.msrb.mxu3 %v394_v33 }
  0xd2   : > { %574 = vmatpush.msrb.mxu0 %v362_v24  ;;  %897 = vmatpush.msrb.mxu2 %v362_v24 }
  0xd3   : > { %615 = vmatpush.msrb.mxu1 %v391_v27  ;;  %905 = vmatpush.msrb.mxu3 %v391_v27  ;;  %v507_v27 = vpop.permute.xlu2 %506 }
  0xd4   : > { %866 = vmatmul.msk.f32.vlgmr.msrb.gmra.mxu0 %vm534_vm2, %v478_v46  ;;  %871 = vmatmul.msk.f32.vlgmr.msrb.gmra.mxu2 %vm534_vm2, %v483_v47 }
  0xd5   : > { %874 = vmatmul.msk.f32.vlgmr.msrb.gmra.mxu1 %vm534_vm2, %v478_v46  ;;  %879 = vmatmul.msk.f32.vlgmr.msrb.gmra.mxu3 %vm534_vm2, %v483_v47 }
  0xdc   : > { %867 = vmatmul.msk.f32.gmra.mxu0 %vm534_vm2, %v479_v50  ;;  %872 = vmatmul.msk.f32.gmra.mxu2 %vm534_vm2, %v484_v51 }
  0xdd   : > { %875 = vmatmul.msk.f32.gmra.mxu1 %vm534_vm2, %v479_v50  ;;  %880 = vmatmul.msk.f32.gmra.mxu3 %vm534_vm2, %v484_v51  ;;  %v659_v51 = vstv %s658_s25 }
  0xe4   : > { %868 = vmatmul.msk.f32.gmra.mxu0 %vm534_vm2, %v480_v53  ;;  %873 = vmatmul.msk.f32.gmra.mxu2 %vm534_vm2, %v485_v54 }
  0xe5   : > { %876 = vmatmul.msk.f32.gmra.mxu1 %vm534_vm2, %v480_v53  ;;  %881 = vmatmul.msk.f32.gmra.mxu3 %vm534_vm2, %v485_v54 }
  0xec   : > { %869 = vmatmul.msk.f32.gmra.mxu0 %vm534_vm2, %v481_v55 }
  0xed   : > { %877 = vmatmul.msk.f32.gmra.mxu1 %vm534_vm2, %v481_v55 }
  0xf4   : > { %870 = vmatmul.msk.f32.gmra.mxu0 %vm534_vm2, %v482_v56 }
  0xf5   : > { %878 = vmatmul.msk.f32.gmra.mxu1 %vm534_vm2, %v482_v56 }
 0x151   : > { %v576_v57 = vpop.f32.mrf.mxu0 }
 0x152   : > { %v617_v58 = vpop.f32.mrf.mxu1  ;;  %v577_v42 = vadd.f32 %v576_v57, %v497_v37 }
 0x153   : > { %v618_v44 = vadd.f32 %v617_v58, %v497_v37 }
 0x154   : > { %v641_v48 = vmax.f32 %v577_v42, 0.0 }
 0x155   : > { %v642_v50 = vmax.f32 %v618_v44, 0.0 }
 0x157   : > { %v591_v59 = vpop.f32.mrf.mxu2 }
 0x158   : > { %v632_v60 = vpop.f32.mrf.mxu3  ;;  %v592_v15 = vadd.f32 %v591_v59, %v522_v4 }
 0x159   : > { %v579_v61 = vpop.f32.mrf.mxu0  ;;  %v633_v18 = vadd.f32 %v632_v60, %v522_v4 }
 0x15a   : > { %v620_v62 = vpop.f32.mrf.mxu1  ;;  %v651_v23 = vmax.f32 %v592_v15, 0.0  ;;  %v580_v38 = vadd.f32 %v579_v61, %v502_v32 }
 0x15b   : > { %v652_v24 = vmax.f32 %v633_v18, 0.0  ;;  %v621_v40 = vadd.f32 %v620_v62, %v502_v32 }
 0x15c   : > { %v643_v46 = vmax.f32 %v580_v38, 0.0 }
 0x15d   : > { %v644_v47 = vmax.f32 %v621_v40, 0.0 }
 0x15f   : > { %v594_v1 = vpop.f32.mrf.mxu2 }
 0x160   : > { %v635_v2 = vpop.f32.mrf.mxu3  ;;  %v595_v8 = vadd.f32 %v594_v1, %v527_v6 }
 0x161   : > { %v582_v3 = vpop.f32.mrf.mxu0  ;;  %v636_v12 = vadd.f32 %v635_v2, %v527_v6 }
 0x162   : > { %v623_v5 = vpop.f32.mrf.mxu1  ;;  %v653_v21 = vmax.f32 %v595_v8, 0.0  ;;  %v583_v33 = vadd.f32 %v582_v3, %v507_v27 }
 0x163   : > { %v654_v22 = vmax.f32 %v636_v12, 0.0  ;;  %v624_v35 = vadd.f32 %v623_v5, %v507_v27 }
 0x164   : > { %v645_v43 = vmax.f32 %v583_v33, 0.0 }
 0x165   : > { %v646_v45 = vmax.f32 %v624_v35, 0.0 }
 0x167   : > { %v597_v7 = vpop.f32.mrf.mxu2 }
 0x168   : > { %v598_v10 = vadd.f32 %v597_v7, %v532_v63  ;;  %v638_v11 = vpop.f32.mrf.mxu3 }
 0x169   : > { %v639_v13 = vadd.f32 %v638_v11, %v532_v63  ;;  %v585_v14 = vpop.f32.mrf.mxu0 }
 0x16a   : > { %v655_v16 = vmax.f32 %v598_v10, 0.0  ;;  %v626_v17 = vpop.f32.mrf.mxu1  ;;  %v586_v26 = vadd.f32 %v585_v14, %v512_v9 }
 0x16b   : > { %v656_v19 = vmax.f32 %v639_v13, 0.0  ;;  %v627_v30 = vadd.f32 %v626_v17, %v512_v9 }
 0x16c   : > { %671 = vmatpush.msra.mxu2 %v655_v16  ;;  %v647_v39 = vmax.f32 %v586_v26, 0.0 }
 0x16d   : > { %691 = vmatpush.msra.mxu3 %v656_v19  ;;  %v648_v41 = vmax.f32 %v627_v30, 0.0 }
 0x16e   : > { %672 = vmatpush.msra.mxu2 %v653_v21 }
 0x16f   : > { %692 = vmatpush.msra.mxu3 %v654_v22 }
 0x170   : > { %673 = vmatpush.msra.mxu2 %v651_v23 }
 0x171   : > { %693 = vmatpush.msra.mxu3 %v652_v24  ;;  %v588_v25 = vpop.f32.mrf.mxu0 }
 0x172   : > { %v589_v28 = vadd.f32 %v588_v25, %v517_v20  ;;  %v629_v29 = vpop.f32.mrf.mxu1 }
 0x173   : > { %v630_v31 = vadd.f32 %v629_v29, %v517_v20 }
 0x174   : > { %v649_v34 = vmax.f32 %v589_v28, 0.0 }
 0x175   : > { %v650_v36 = vmax.f32 %v630_v31, 0.0 }
 0x176   : > { %674 = vmatpush.msra.mxu2 %v649_v34 }
 0x177   : > { %694 = vmatpush.msra.mxu3 %v650_v36 }
 0x178   : > { %675 = vmatpush.msra.mxu2 %v647_v39 }
 0x179   : > { %695 = vmatpush.msra.mxu3 %v648_v41 }
 0x17a   : > { %676 = vmatpush.msra.mxu2 %v645_v43 }
 0x17b   : > { %696 = vmatpush.msra.mxu3 %v646_v45 }
 0x17c   : > { %677 = vmatpush.msra.mxu2 %v643_v46 }
 0x17d   : > { %697 = vmatpush.msra.mxu3 %v644_v47 }
 0x17e   : > { %678 = vmatpush.msra.mxu2 %v641_v48 }
 0x17f   : > { %698 = vmatpush.msra.mxu3 %v642_v50  ;;  %882 = vmatmul.msk.f32.vlgmr.msra.gmra.mxu2 %vm534_vm2, %v657_v49 }
 0x180   : > { %883 = vmatmul.msk.f32.vlgmr.msra.gmra.mxu3 %vm534_vm2, %v657_v49 }
 0x202   : > { %v680_v52 = vpop.f32.mrf.mxu2 }
 0x203   : > { %v700_v53 = vpop.f32.mrf.mxu3  ;;  %v681_v54 = vadd.f32 %v680_v52, %v659_v51 }
 0x204   : > { %v701_v55 = vadd.f32 %v700_v53, %v659_v51 }
 0x205   : > { %v884_v56 = vmul.f32 -1.442695, %v681_v54 }
 0x206   : > { %v885_v57 = vmul.f32 -1.442695, %v701_v55 }
 0x207   : > { %950 = vpow2.f32 %v884_v56 }
 0x208   : > { %952 = vpow2.f32 %v885_v57 }
 0x20d   : > { %v951_v58 = vpop.eup %950 }
 0x20e   : > { %v953_v59 = vpop.eup %952  ;;  %v709_v60 = vadd.f32 1.0, %v951_v58 }
 0x20f   : > { %v710_v61 = vadd.f32 1.0, %v953_v59 }
 0x210   : > { %954 = vrcp.f32 %v709_v60  ;;  %vm716_vm5 = vweird.f32 %v709_v60  ;;  %v722_v10 = vand.u32 2147483648, %v709_v60  ;;  %v720_v12 = vand.u32 2147483647, %v709_v60 }
 0x211   : > { %956 = vrcp.f32 %v710_v61  ;;  %v737_v6 = vand.u32 2147483648, %v710_v61  ;;  %v735_v8 = vand.u32 2147483647, %v710_v61  ;;  %vm731_vm6 = vweird.f32 %v710_v61 }
 0x212   : > { %v723_v17 = vor.u32 1.1754944e-38, %v722_v10  ;;  %vm721_vm11 = vcmp.eq.f32.partialorder %v720_v12, 8.507059e+37 }
 0x213   : > { %v738_v14 = vor.u32 1.1754944e-38, %v737_v6  ;;  %vm736_vm9 = vcmp.eq.f32.partialorder %v735_v8, 8.507059e+37 }
 0x216   : > { %v955_v62 = vpop.eup %954 }
 0x217   : > { %v957_v63 = vpop.eup %956  ;;  %v712_v1 = vmul.f32 %v955_v62, %v709_v60  ;;  %vm717_vm3 = vweird.f32 %v955_v62 }
 0x218   : > { %v727_v2 = vmul.f32 %v957_v63, %v710_v61  ;;  %vm732_vm4 = vweird.f32 %v957_v63  ;;  %vm1238_vm7 = vmor %vm716_vm5, %vm717_vm3 }
 0x219   : > { %v713_v3 = vsub.f32 1.0, %v712_v1  ;;  %vm733_vm8 = vmor %vm731_vm6, %vm732_vm4 }
 0x21a   : > { %v728_v4 = vsub.f32 1.0, %v727_v2 }
 0x21b   : > { %v714_v5 = vmul.f32 %v955_v62, %v713_v3 }
 0x21c   : > { %v729_v7 = vmul.f32 %v957_v63, %v728_v4 }
 0x21d   : > { %v715_v9 = vadd.f32 %v955_v62, %v714_v5 }
 0x21e   : > { %v730_v13 = vadd.f32 %v957_v63, %v729_v7 }
 0x21f   : > { %v719_v15 = vsel %vm1238_vm7, %v955_v62, %v715_v9 }
 0x220   : > { %v734_v16 = vsel %vm733_vm8, %v957_v63, %v730_v13  ;;  %v724_v20 = vsel %vm721_vm11, %v723_v17, %v719_v15 }
 0x221   : > { %v739_v18 = vsel %vm736_vm9, %v738_v14, %v734_v16 }
 0x222   : > { %v743_v19 = vrot.slane %v739_v18, 7 }
 0x224   : > { %v745_v21 = vsel %vm744_vm10, %v724_v20, %v743_v19 }
 0x225   : > { %751 = vst.msk [vmem:[%s273_s16] sm:$0x3] %vm749_vm12, %v745_v21 }
 0x226   : > { %985 = shalt.err (!%p982_p3)
}
 0x227   : > { %906 = dma.vmem_to_hbm [thread:$0]  (%p1102_p5), %s766_s17, 32, %s768_s18, %s753_s14  }
 0x228 PF: > { %p912_p4 = scmp.ge.s32.totalorder %s1020_s29, 2  ;;  %s779_s6 = sand.u32 1, %s1008_s26  }
 0x229   : > { %s780_s30 = scalar_lea.sflag [#allocation4], %s779_s6 }
 0x22a   : > { %p909_p7 = pnand %p912_p4, %p1106_p6 }
 0x22c   : > { %p910_p8 = pneg %p909_p7 }
 0x22e   : > { %1003 = dma.done.wait (%p910_p8), %s780_s30, 32  }
 0x22f   : > { %1005 = vsyncadd (%p910_p8), %s780_s30, 4294967264  ;;  %p18_p9 = scmp.ge.s32.totalorder %s1090_s8, 6   ;;  %s1287_s26 = smov %s1012_s27 }
 0x230   : > { %s1288_s27 = smov %s1016_s28  ;;  %s1289_s28 = smov %s1100_s11 }
 0x231   : > { %s1290_s29 = smov %s1090_s8  ;;  %20 = sbr.rel (!%p18_p9) target bundleno = 5 (0x5), region = 83 }
 0x236   :  { %786 = vsyncpa [#allocation4], 1 }
 0x237   :  { %788 = vsyncpa [#allocation4 + $0x1], 1 }

</bundles_post_ra>
